<compile_context>
chip_gen: v7x
topology: tpu7x:2x2x1
jax: 0.10.0
libtpu: 0.0.40
codegen_flags: <defaults>
</compile_context>

<pallas_src>
import functools
import math

import jax
import jax.numpy as jnp
import numpy as np
from jax.experimental import pallas as pl
from jax.experimental.pallas import tpu as pltpu


def _pe_add_kernel(off_ref, row_ref, freq_ref, phase_ref, x_ref, o_ref, *, seq_tile):
    """Adds the sinusoidal positional encoding to one (B, tS*D) flattened tile.

    off_ref   : SMEM scalar-prefetch ref, shape (1,), int32 -- runtime `offset`
    row_ref   : VMEM (1, tS*D) f32 -- within-tile sequence-row index per flat element
    freq_ref  : VMEM (1, tS*D) f32 -- div_term replicated per column
    phase_ref : VMEM (1, tS*D) f32 -- 0 for even cols, pi/2 for odd cols (cos -> sin shift)
    x_ref     : VMEM (B, tS*D)
    o_ref     : VMEM (B, tS*D)
    """
    # Absolute position of the first row of this sequence tile.
    base = (off_ref[0] + pl.program_id(0) * seq_tile).astype(jnp.float32)
    pos = base + row_ref[...]                           # (1, tS*D)
    angle = pos * freq_ref[...] + phase_ref[...]        # (1, tS*D)
    pe = jnp.sin(angle)                                 # single transcendental (EUP)
    # Add in f32, cast once to the output dtype; broadcast over the batch rows.
    o_ref[...] = (x_ref[...].astype(jnp.float32) + pe).astype(o_ref.dtype)


def _choose_seq_tile(B, S, D, itemsize, target_bytes=2 * 1024 * 1024):
    """Largest ts dividing S with (ts*D) % 128 == 0 and x-block <= ~target_bytes.

    Keeps double-buffered in+out blocks well under every generation's default
    scoped-VMEM limit (v5e 16 MiB, v6e/v7x 32 MiB) and stores lane-dense.
    Falls back to ts = S (full-extent block is always a legal BlockSpec shape).
    """
    max_ts = max(1, target_bytes // max(1, B * D * itemsize))
    candidates = [ts for ts in range(1, S + 1)
                  if S % ts == 0 and ts <= max_ts and (ts * D) % 128 == 0]
    if candidates:
        return max(candidates)
    return S


def positional_encoding_add(x, offset=0):
    """x: (B, S, D) array. Returns x + pe[offset:offset+S] (same dtype as x)."""
    B, S, D = x.shape
    assert D % 2 == 0, "d_model must be even (matches the PyTorch buffer layout)"

    ts = _choose_seq_tile(B, S, D, x.dtype.itemsize)
    C = ts * D
    nt = S // ts

    # ---- trace-time constants (shared by every grid step / batch row) ----
    # div_term exactly as in the PyTorch __init__ (float32 math).
    div = np.exp(np.arange(0, D, 2, dtype=np.float32)
                 * np.float32(-math.log(10000.0) / D)).astype(np.float32)
    freq_d = np.repeat(div, 2)[:D].astype(np.float32)                       # per-column frequency
    phase_d = np.where(np.arange(D) % 2 == 1,
                       np.float32(np.pi / 2.0), np.float32(0.0)).astype(np.float32)
    row_flat = np.repeat(np.arange(ts, dtype=np.float32), D)                # within-tile row
    row_c = jnp.asarray(row_flat.reshape(1, C))
    freq_c = jnp.asarray(np.tile(freq_d, ts).reshape(1, C))
    phase_c = jnp.asarray(np.tile(phase_d, ts).reshape(1, C))

    off = jnp.asarray([offset], dtype=jnp.int32)
    x2d = x.reshape(B, S * D)   # bitcast reshape -> lane-dense last dim

    kernel = functools.partial(_pe_add_kernel, seq_tile=ts)

    const_spec = pl.BlockSpec((1, C), lambda s, off: (0, 0))   # resident, DMA'd once
    data_spec = pl.BlockSpec((B, C), lambda s, off: (0, s))

    out2d = pl.pallas_call(
        kernel,
        out_shape=jax.ShapeDtypeStruct((B, S * D), x.dtype),
        grid_spec=pltpu.PrefetchScalarGridSpec(
            num_scalar_prefetch=1,                 # `offset` lands in SMEM
            grid=(nt,),                            # sequence tiles
            in_specs=[const_spec, const_spec, const_spec, data_spec],
            out_specs=data_spec,
        ),
        compiler_params=pltpu.CompilerParams(dimension_semantics=("parallel",)),
        input_output_aliases={4: 0},               # x (input idx 4 incl. prefetch) -> output 0
    )(off, row_c, freq_c, phase_c, x2d)

    return out2d.reshape(B, S, D)


def _reference_pe_buffer(max_len, d_model):
    """Numpy replica of the PyTorch __init__ buffer construction."""
    pe = np.zeros((max_len, d_model), dtype=np.float32)
    position = np.arange(0, max_len, dtype=np.float32)[:, None]
    div_term = np.exp(np.arange(0, d_model, 2, dtype=np.float32)
                      * (-math.log(10000.0) / d_model))
    pe[:, 0::2] = np.sin(position * div_term)
    pe[:, 1::2] = np.cos(position * div_term)
    return pe[None]  # (1, max_len, d_model)


if __name__ == "__main__":
    B, S, D = 2, 8, 32
    offset = 3

    key = jax.random.PRNGKey(0)
    x = jax.random.normal(key, (B, S, D), dtype=jnp.float32)
    x_np = np.asarray(x)   # snapshot before the call (x may be aliased/donated)

    out = jax.block_until_ready(positional_encoding_add(x, offset=offset))

    # Pure-numpy reference matching the PyTorch forward exactly.
    pe = _reference_pe_buffer(max_len=5000, d_model=D)
    ref = x_np + pe[:, offset:offset + S, :]

    np.testing.assert_allclose(np.asarray(out), ref, rtol=1e-5, atol=1e-5)
    print("KERNEL_OK")
</pallas_src>

<mosaic_0001>
module attributes {stable_mosaic.version = 11 : i64} {
  func.func @_pe_add_kernel(%arg0: i32, %arg1: memref<1xi32, #tpu.memory_space<smem>>, %arg2: memref<1x256xf32, #tpu.memory_space<vmem>>, %arg3: memref<1x256xf32, #tpu.memory_space<vmem>>, %arg4: memref<1x256xf32, #tpu.memory_space<vmem>>, %arg5: memref<2x256xf32, #tpu.memory_space<vmem>>, %arg6: memref<2x256xf32, #tpu.memory_space<vmem>>) attributes {dimension_semantics = [#tpu.dimension_semantics<parallel>], iteration_bounds = array<i64: 1>, scalar_prefetch = 1 : i64, scratch_operands = 0 : i64, tpu.core_type = #tpu.core_type<tc>, window_params = [{pipeline_mode = #tpu.pipeline_mode<synchronous>, transform_indices = @transform_0, window_bounds = array<i64: 1, 256>}, {pipeline_mode = #tpu.pipeline_mode<synchronous>, transform_indices = @transform_1, window_bounds = array<i64: 1, 256>}, {pipeline_mode = #tpu.pipeline_mode<synchronous>, transform_indices = @transform_2, window_bounds = array<i64: 1, 256>}, {transform_indices = @transform_3, window_bounds = array<i64: 2, 256>}, {transform_indices = @transform_4, window_bounds = array<i64: 2, 256>}]} {
    %c0 = arith.constant 0 : index
    %0 = memref.load %arg1[%c0] : memref<1xi32, #tpu.memory_space<smem>>
    %c8_i32 = arith.constant 8 : i32
    %1 = arith.muli %arg0, %c8_i32 : i32
    %2 = arith.addi %0, %1 : i32
    %3 = arith.sitofp %2 : i32 to f32
    %c0_0 = arith.constant 0 : index
    %c0_1 = arith.constant 0 : index
    %4 = vector.load %arg2[%c0_0, %c0_1] : memref<1x256xf32, #tpu.memory_space<vmem>>, vector<1x256xf32>
    %5 = vector.broadcast %3 : f32 to vector<1x256xf32>
    %6 = arith.addf %5, %4 : vector<1x256xf32>
    %c0_2 = arith.constant 0 : index
    %c0_3 = arith.constant 0 : index
    %7 = vector.load %arg3[%c0_2, %c0_3] : memref<1x256xf32, #tpu.memory_space<vmem>>, vector<1x256xf32>
    %8 = arith.mulf %6, %7 : vector<1x256xf32>
    %c0_4 = arith.constant 0 : index
    %c0_5 = arith.constant 0 : index
    %9 = vector.load %arg4[%c0_4, %c0_5] : memref<1x256xf32, #tpu.memory_space<vmem>>, vector<1x256xf32>
    %10 = arith.addf %8, %9 : vector<1x256xf32>
    %11 = math.sin %10 : vector<1x256xf32>
    %c0_6 = arith.constant 0 : index
    %c0_7 = arith.constant 0 : index
    %12 = vector.load %arg5[%c0_6, %c0_7] : memref<2x256xf32, #tpu.memory_space<vmem>>, vector<2x256xf32>
    %13 = vector.broadcast %11 : vector<1x256xf32> to vector<2x256xf32>
    %14 = arith.addf %12, %13 : vector<2x256xf32>
    %c0_8 = arith.constant 0 : index
    %c0_9 = arith.constant 0 : index
    %15 = vector.load %arg6[%c0_8, %c0_9] : memref<2x256xf32, #tpu.memory_space<vmem>>, vector<2x256xf32>
    tpu.vector_store %arg6[%c0_8, %c0_9], %14 {strides = array<i32>} : memref<2x256xf32, #tpu.memory_space<vmem>>, vector<2x256xf32>,
    return
  }
  func.func @transform_0(%arg0: i32, %arg1: memref<1xi32, #tpu.memory_space<smem>>) -> (i32, i32) {
    %c0_i32 = arith.constant 0 : i32
    %c0_i32_0 = arith.constant 0 : i32
    %c0_i32_1 = arith.constant 0 : i32
    return %c0_i32, %c0_i32_0 : i32, i32
  }
  func.func @transform_1(%arg0: i32, %arg1: memref<1xi32, #tpu.memory_space<smem>>) -> (i32, i32) {
    %c0_i32 = arith.constant 0 : i32
    %c0_i32_0 = arith.constant 0 : i32
    %c0_i32_1 = arith.constant 0 : i32
    return %c0_i32, %c0_i32_0 : i32, i32
  }
  func.func @transform_2(%arg0: i32, %arg1: memref<1xi32, #tpu.memory_space<smem>>) -> (i32, i32) {
    %c0_i32 = arith.constant 0 : i32
    %c0_i32_0 = arith.constant 0 : i32
    %c0_i32_1 = arith.constant 0 : i32
    return %c0_i32, %c0_i32_0 : i32, i32
  }
  func.func @transform_3(%arg0: i32, %arg1: memref<1xi32, #tpu.memory_space<smem>>) -> (i32, i32) {
    %c0_i32 = arith.constant 0 : i32
    %c0_i32_0 = arith.constant 0 : i32
    return %c0_i32, %arg0 : i32, i32
  }
  func.func @transform_4(%arg0: i32, %arg1: memref<1xi32, #tpu.memory_space<smem>>) -> (i32, i32) {
    %c0_i32 = arith.constant 0 : i32
    %c0_i32_0 = arith.constant 0 : i32
    return %c0_i32, %arg0 : i32, i32
  }
}

</mosaic_0001>

<bundles_post_ra>
// kernel: tpu_custom_call.1
= control target key start
LH: loop header
LB: loop body
LE: loop exit
PB: predicated region body
PF: predicated region fallthrough
CT: control target
= control target key end

     0   :  { %11 = vsyncpa [#allocation5], 0  ;;  %s348_s0 = inlined_call_operand.<no memory space> [shape: s32[1], index: 0, kind: input, shape index: {}]   ;;  %s349_s1 = inlined_call_operand.vmem [shape: f32[1,256], index: 1, kind: input, shape index: {}]   ;;  %s350_s2 = inlined_call_operand.vmem [shape: f32[1,256], index: 2, kind: input, shape index: {}]   ;;  %s351_s3 = inlined_call_operand.vmem [shape: f32[1,256], index: 3, kind: input, shape index: {}]   ;;  %s352_s4 = inlined_call_operand.hbm [shape: f32[2,256], index: 4, kind: input, shape index: {}, may-alias: {4,5}]   ;;  %s353_s5 = inlined_call_operand.hbm [shape: f32[2,256], index: 5, kind: output, shape index: {}, may-alias: {4,5}]  }
   0x1   :  { %12 = vsyncpa [#allocation6], 0  ;;  %s252_s18 = smov [#allocation4]   ;;  %s204_s22 = scalar_lea.hbm %s352_s4, 64 }
   0x2   :  { %s25_s19 = sshll.u32 %s252_s18, 4  ;;  %p205_p0 = scmp.ne.s32.totalorder %s352_s4, %s204_s22  ;;  %s26_s19 = int_to_ptr.vmem [resolvable:$true] %s25_s19 }
   0x3   :  { %p208_p1 = scmp.lt.u32.totalorder %s204_s22, %s352_s4 }
   0x5   :  { %p210_p2 = pnand %p208_p1, %p205_p0 }
   0x7   :  { %213 = shalt.err (!%p210_p2)
}
   0x8   :  { %s214_s27 = scalar_lea.vmem %s26_s19, 64  ;;  %p219_p4 = scmp.lt.s32.totalorder %s26_s19, %s26_s19 }
   0x9   :  { %p215_p3 = scmp.ne.s32.totalorder %s26_s19, %s214_s27  ;;  %p220_p5 = scmp.lt.s32.totalorder %s214_s27, %s214_s27 }
   0xb   :  { %p221_p6 = por %p220_p5, %p219_p4 }
   0xd   :  { %p222_p7 = pnand %p221_p6, %p215_p3 }
   0xf   :  { %225 = shalt.err (!%p222_p7)
}
  0x10   :  { %28 = dma.hbm_to_vmem [thread:$0]  %s352_s4, 64, %s26_s19, [#allocation5]  }
  0x11   :  { %248 = dma.done.wait [#allocation5], 64  }
  0x12   :  { %249 = vsyncadd [#allocation5], 4294967232  ;;  %s35_s7 = scvt.s32.f32 %s348_s0  ;;  %v36_v1 = vld [vmem:[%s349_s1] sm:$0x3]  ;;  %v253_v18 = vmov 683565275  }
  0x13   :  { %v39_v2 = vld [vmem:[%s350_s2] sm:$0x3]  ;;  %v254_v20 = vmov 2475754826   ;;  %v255_v22 = vmov 2131351028  }
  0x14   :  { %v37_v0 = vstv %s35_s7  ;;  %v41_v4 = vld [vmem:[%s351_s3] sm:$0x3]  ;;  %v256_v24 = vmov 2102212464   ;;  %v257_v26 = vmov 920167782  }
  0x15   :  { %v38_v3 = vadd.f32 %v37_v0, %v36_v1  ;;  %v258_v33 = vmov 1326507024   ;;  %s260_s0 = smov [#allocation7]  }
  0x16   :  { %s174_s1 = sshll.u32 %s260_s0, 4  ;;  %s175_s1 = int_to_ptr.vmem [resolvable:$true] %s174_s1 }
  0x17   :  { %v40_v5 = vmul.f32 %v39_v2, %v38_v3  ;;  %s226_s2 = scalar_lea.vmem %s175_s1, 64  ;;  %p231_p9 = scmp.lt.s32.totalorder %s175_s1, %s175_s1 }
  0x18   :  { %p227_p8 = scmp.ne.s32.totalorder %s175_s1, %s226_s2  ;;  %p232_p10 = scmp.lt.s32.totalorder %s226_s2, %s226_s2 }
  0x19   :  { %v315_v6 = vadd.f32 %v41_v4, %v40_v5 }
  0x1a   :  { %p233_p11 = por %p232_p10, %p231_p9 }
  0x1b   :  { %v46_v7 = vand.u32 2139095040, %v315_v6  ;;  %v43_v9 = vand.u32 2147483647, %v315_v6  ;;  %vm45_vm7 = vcmp.lt.s32.totalorder %v315_v6, 0  ;;  %vm135_vm12 = vweird.f32 %v315_v6 }
  0x1c   :  { %p234_p12 = pnand %p233_p11, %p227_p8 }
  0x1d   :  { %v47_v8 = vshrl.u32 %v46_v7, 23  ;;  %v50_v12 = vand.u32 8388607, %v43_v9  ;;  %vm44_vm8 = vcmp.le.f32.partialorder %v43_v9, 0.7853982 }
  0x1f   :  { %v183_v10 = vadd.s32 4294967169, %v47_v8  ;;  %v51_v15 = vor.u32 8388608, %v50_v12 }
  0x21   :  { %v53_v11 = vadd.s32 1, %v183_v10  ;;  %v91_v35 = vshll.u32 %v51_v15, 8 }
  0x23   :  { %vm54_vm0 = vcmp.gt.s32.totalorder %v53_v11, 0 }
  0x24   :  { %v55_v13 = vsel %vm54_vm0, %v53_v11, 0 }
  0x25   :  { %v57_v14 = vand.u32 31, %v55_v13  ;;  %v56_v16 = vshrl.u32 %v55_v13, 5 }
  0x27   :  { %v58_v17 = vsub.s32 32, %v57_v14  ;;  %v60_v19 = vshll.u32 %v253_v18, %v57_v14  ;;  %v63_v21 = vshll.u32 %v254_v20, %v57_v14  ;;  %v66_v23 = vshll.u32 %v255_v22, %v57_v14 }
  0x28   :  { %v69_v25 = vshll.u32 %v256_v24, %v57_v14  ;;  %v72_v27 = vshll.u32 %v257_v26, %v57_v14  ;;  %vm75_vm1 = vcmp.lt.s32.totalorder %v56_v16, 1  ;;  %vm78_vm2 = vcmp.lt.s32.totalorder %v56_v16, 4 }
  0x29   :  { %v59_v28 = vshrl.u32 %v253_v18, %v58_v17  ;;  %v61_v29 = vshrl.u32 %v254_v20, %v58_v17  ;;  %v64_v30 = vshrl.u32 %v255_v22, %v58_v17  ;;  %v67_v31 = vshrl.u32 %v256_v24, %v58_v17 }
  0x2a   :  { %v70_v32 = vshrl.u32 %v257_v26, %v58_v17  ;;  %v73_v34 = vshrl.u32 %v258_v33, %v58_v17  ;;  %vm76_vm3 = vcmp.lt.s32.totalorder %v56_v16, 2  ;;  %vm77_vm4 = vcmp.lt.s32.totalorder %v56_v16, 3 }
  0x2b   :  { %v62_v36 = vor.u32 %v61_v29, %v60_v19  ;;  %v65_v37 = vor.u32 %v64_v30, %v63_v21  ;;  %v68_v38 = vor.u32 %v67_v31, %v66_v23  ;;  %v259_v30 = vmov 1983009808  }
  0x2c   :  { %v71_v39 = vor.u32 %v70_v32, %v69_v25  ;;  %v74_v40 = vor.u32 %v73_v34, %v72_v27  ;;  %v149_v27 = vlaneseq  ;;  %v159_v31 = vunpack.c.l.s4 %v259_v30 }
  0x2d   :  { %v79_v41 = vsel %vm75_vm1, %v59_v28, %v62_v36  ;;  %v80_v42 = vsel %vm78_vm2, %v68_v38, 2102212464  ;;  %v83_v43 = vsel %vm75_vm1, %v62_v36, %v65_v37  ;;  %v87_v44 = vsel %vm75_vm1, %v65_v37, %v68_v38 }
  0x2e   :  { %v81_v45 = vsel %vm77_vm4, %v65_v37, %v80_v42  ;;  %v84_v46 = vsel %vm78_vm2, %v71_v39, 920167782  ;;  %v88_v47 = vsel %vm78_vm2, %v74_v40, 1326507024  ;;  %v150_v29 = vshrl.u32 %v149_v27, 7 }
  0x2f   :  { %v85_v48 = vsel %vm77_vm4, %v68_v38, %v84_v46  ;;  %v89_v49 = vsel %vm77_vm4, %v71_v39, %v88_v47  ;;  %v82_v50 = vsel %vm76_vm3, %v79_v41, %v81_v45  ;;  %v160_v38 = vunpack.c.0.s8 %v159_v31  ;;  %v147_v46 = vld [vmem:[#allocation4] sm:$0xf] }
  0x30   :  { %v86_v51 = vsel %vm76_vm3, %v83_v43, %v85_v48  ;;  %v90_v52 = vsel %vm76_vm3, %v87_v44, %v89_v49  ;;  %v98_v57 = vmul.u32 %v91_v35, %v82_v50  ;;  %v155_v37 = vsub.s32 1, %v150_v29 }
  0x31   :  { %v321_v53 = vmul.u32.u64.low %v91_v35, %v90_v52  ;;  %v322_v54 = vmul.u32.u64.high %v91_v35, %v90_v52, %v321_v53  ;;  %v324_v55 = vmul.u32.u64.low %v91_v35, %v86_v51  ;;  %v325_v56 = vmul.u32.u64.high %v91_v35, %v86_v51, %v324_v55 }
  0x32   :  { %v151_v35 = vsub.s32 0, %v150_v29  ;;  %v163_v44 = vsub.s32 %v160_v38, %v150_v29 }
  0x33   :  { %vm100_vm5 = vc.u32 %v322_v54, %v324_v55  ;;  %v101_v58 = vadd.s32 1, %v325_v56  ;;  %v99_v5 = vadd.s32 %v324_v55, %v322_v54 }
  0x35   :  { %v102_v59 = vsel %vm100_vm5, %v101_v58, %v325_v56 }
  0x36   :  { %v103_v60 = vadd.s32 %v102_v59, %v98_v57 }
  0x38   :  { %v104_v61 = vadd.s32 536870912, %v103_v60 }
  0x3a   :  { %v105_v62 = vshrl.u32 %v104_v61, 30 }
  0x3c   :  { %v106_v63 = vshll.u32 %v105_v62, 30  ;;  %v129_v19 = vsub.s32 4, %v105_v62 }
  0x3e   :  { %v107_v0 = vsub.s32 %v103_v60, %v106_v63  ;;  %v130_v22 = vsel %vm45_vm7, %v129_v19, %v105_v62 }
  0x3f   :  { %v132_v25 = vsel %vm44_vm8, 0, %v130_v22 }
  0x40   :  { %v109_v1 = vsub.s32 0, %v107_v0  ;;  %v136_v26 = vadd.s32 3, %v132_v25 }
  0x42   :  { %v184_v2 = vmin.u32 %v109_v1, %v107_v0  ;;  %v137_v28 = vand.u32 3, %v136_v26 }
  0x44   :  { %v111_v3 = vclz %v184_v2  ;;  %vm142_vm9 = vcmp.eq.s32.totalorder %v137_v28, 2  ;;  %vm139_vm10 = vcmp.eq.s32.totalorder %v137_v28, 0  ;;  %vm138_vm11 = vcmp.lt.s32.totalorder %v137_v28, 2 }
  0x46   :  { %v185_v4 = vadd.s32 4294967294, %v111_v3 }
  0x48   :  { %vm186_vm6 = vcmp.lt.s32.totalorder %v185_v4, 0 }
  0x49   :  { %v114_v7 = vsel %vm186_vm6, 0, %v185_v4 }
  0x4a   :  { %v115_v8 = vsub.s32 32, %v114_v7  ;;  %v116_v10 = vshll.u32 %v107_v0, %v114_v7  ;;  %v119_v11 = vsub.s32 4294967266, %v114_v7 }
  0x4c   :  { %v117_v12 = vshrl.u32 %v99_v5, %v115_v8  ;;  %v120_v13 = vadd.s32 127, %v119_v11 }
  0x4e   :  { %v118_v14 = vor.u32 %v117_v12, %v116_v10  ;;  %v121_v15 = vshll.u32 %v120_v13, 23 }
  0x50   :  { %v122_v16 = vor.u32 4788187, %v121_v15  ;;  %v125_v17 = vcvt.s32.f32 %v118_v14 }
  0x52   :  { %v123_v18 = vand.u32 2147483647, %v122_v16 }
  0x54   :  { %v126_v20 = vmul.f32 %v125_v17, %v123_v18 }
  0x56   :  { %v127_v21 = vxor.u32 2147483648, %v126_v20 }
  0x58   :  { %v128_v23 = vsel %vm45_vm7, %v127_v21, %v126_v20 }
  0x59   :  { %v131_v24 = vsel %vm44_vm8, %v315_v6, %v128_v23 }
  0x5a   :  { %200 = vcosq.f32 %v131_v24 }
  0x5b   :  { %202 = vsinq.f32 %v131_v24 }
  0x64   :  { %v201_v32 = vpop.eup %200 }
  0x65   :  { %v203_v33 = vpop.eup %202  ;;  %v143_v34 = vxor.u32 2147483648, %v201_v32 }
  0x66   :  { %v140_v9 = vxor.u32 2147483648, %v203_v33 }
  0x67   :  { %v144_v36 = vsel %vm142_vm9, %v143_v34, %v203_v33 }
  0x68   :  { %v141_v39 = vsel %vm139_vm10, %v201_v32, %v140_v9 }
  0x69   :  { %v145_v40 = vsel %vm138_vm11, %v141_v39, %v144_v36 }
  0x6a   :  { %v146_v41 = vsel %vm135_vm12, nan, %v145_v40 }
  0x6b   :  { %v152_v42 = vrot.slane %v146_v41, %v151_v35  ;;  %v156_v43 = vrot.slane %v146_v41, %v155_v37 }
  0x6d   :  { %v157_v45 = vcombine.low %v152_v42, %v156_v43 }
  0x6f   :  { %v164_v47 = vrot.slane %v157_v45, %v163_v44 }
  0x71   :  { %v166_v48 = vadd.f32 %v164_v47, %v147_v46 }
  0x73   :  { %167 = vst [vmem:[#allocation7] sm:$0xf] %v166_v48 }
  0x74   :  { %237 = shalt.err (!%p234_p12)
}
  0x75   :  { %s238_s14 = scalar_lea.hbm %s353_s5, 64 }
  0x76   :  { %p239_p13 = scmp.ne.s32.totalorder %s353_s5, %s238_s14  ;;  %p242_p0 = scmp.lt.u32.totalorder %s238_s14, %s353_s5 }
  0x78   :  { %p244_p1 = pnand %p242_p0, %p239_p13 }
  0x7a   :  { %247 = shalt.err (!%p244_p1)
}
  0x7b   :  { %177 = dma.vmem_to_hbm [thread:$0]  %s175_s1, 64, %s353_s5, [#allocation6]  }
  0x7c   :  { %250 = dma.done.wait [#allocation6], 64  }
  0x7d   :  { %251 = vsyncadd [#allocation6], 4294967232 }
  0x7e   :  { %181 = vsyncpa [#allocation5], 1 }
  0x7f   :  { %182 = vsyncpa [#allocation6], 1 }

</bundles_post_ra>
